<compile_context>
chip_gen: v5e
topology: v5e:2x2
jax: 0.10.0
libtpu: 0.0.40
codegen_flags: <defaults>
</compile_context>

<pallas_src>
import functools
import math
from typing import NamedTuple

import jax
import jax.numpy as jnp
from jax import lax
from jax.experimental import pallas as pl
from jax.experimental.pallas import tpu as pltpu


_VMEM = pl.BlockSpec(memory_space=pltpu.MemorySpace.VMEM)
_DN = (((1,), (1,)), ((), ()))   # contract last dims:  x @ w.T  (F.linear)


def _approx_recip(x):
    # Reviewed micro-opt: push the renorm divide to the EUP.  Falls back to a
    # plain divide on jax versions without pl.reciprocal.
    if hasattr(pl, "reciprocal"):
        return pl.reciprocal(x, approx=True)
    return 1.0 / x


# --------------------------------------------------------------------------
# Pallas kernels (all scalars baked in as compile-time constants)
# --------------------------------------------------------------------------

def _scaled_linear_kernel(gamma):
    def kernel(x_ref, w_ref, o_ref):
        o_ref[...] = gamma * lax.dot_general(
            x_ref[...], w_ref[...], _DN, preferred_element_type=jnp.float32)
    return kernel


@functools.lru_cache(maxsize=None)
def _get_scaled_linear(rows, in_dim, out_dim, gamma):
    return pl.pallas_call(
        _scaled_linear_kernel(gamma),
        out_shape=jax.ShapeDtypeStruct((rows, out_dim), jnp.float32),
        in_specs=[_VMEM, _VMEM],
        out_specs=_VMEM,
    )


def scaled_linear(x, w, gamma):
    """gamma * F.linear(x, w) as one Pallas GEMM; x is (in,) or (rows, in)."""
    squeeze = (x.ndim == 1)
    x2 = x[None, :] if squeeze else x
    fn = _get_scaled_linear(int(x2.shape[0]), int(x2.shape[1]),
                            int(w.shape[0]), float(gamma))
    out = fn(x2, w)
    return out[0] if squeeze else out


def _hebb_hpc_lec_kernel(hpc_size, l_hh, l_pl):
    # Fused per-timestep plasticity:
    #   hpc_hpc <- zero_diag(hpc_hpc + l_hh * outer(hpc, hpc))
    #   pfc_lec <- pfc_lec + l_pl * outer(pfc, lec)
    def kernel(whh_ref, wpl_ref, hpc_c_ref, hpc_r_ref, pfc_c_ref, lec_r_ref,
               whh_o, wpl_o):
        # off-diagonal mask built in-kernel from two iotas (no mask DMA);
        # zeroing the whole diagonal exactly matches fill_diagonal_(0).
        r = lax.broadcasted_iota(jnp.int32, (hpc_size, hpc_size), 0)
        c = lax.broadcasted_iota(jnp.int32, (hpc_size, hpc_size), 1)
        w_new = whh_ref[...] + l_hh * (hpc_c_ref[...] * hpc_r_ref[...])
        whh_o[...] = jnp.where(r == c, 0.0, w_new)
        wpl_o[...] = wpl_ref[...] + l_pl * (pfc_c_ref[...] * lec_r_ref[...])
    return kernel


@functools.lru_cache(maxsize=None)
def _get_hebb_hpc_lec(hpc_size, pfc_size, lec_size, l_hh, l_pl):
    return pl.pallas_call(
        _hebb_hpc_lec_kernel(hpc_size, l_hh, l_pl),
        out_shape=(jax.ShapeDtypeStruct((hpc_size, hpc_size), jnp.float32),
                   jax.ShapeDtypeStruct((pfc_size, lec_size), jnp.float32)),
        in_specs=[_VMEM] * 6,
        out_specs=(_VMEM, _VMEM),
        input_output_aliases={0: 0, 1: 1},
    )


def _renorm(w, max_post, max_pre):
    # Matches the reference exactly: signed sums, scale only rows/cols that
    # exceed the cap (the discarded branch of the where may contain inf/nan
    # for zero sums, which is benign).
    post = jnp.sum(w, axis=1, keepdims=True)
    w = w * jnp.where(post > max_post, max_post * _approx_recip(post), 1.0)
    pre = jnp.sum(w, axis=0, keepdims=True)
    w = w * jnp.where(pre > max_pre, max_pre * _approx_recip(pre), 1.0)
    return w


def _hebb_renorm_kernel(lmbda, max_post, max_pre):
    # Fused: w <- renorm(w + lmbda * outer(a, b))
    def kernel(w_ref, a_c_ref, b_r_ref, o_ref):
        w = w_ref[...] + lmbda * (a_c_ref[...] * b_r_ref[...])
        o_ref[...] = _renorm(w, max_post, max_pre)
    return kernel


@functools.lru_cache(maxsize=None)
def _get_hebb_renorm(out_dim, in_dim, lmbda, max_post, max_pre):
    return pl.pallas_call(
        _hebb_renorm_kernel(lmbda, max_post, max_pre),
        out_shape=jax.ShapeDtypeStruct((out_dim, in_dim), jnp.float32),
        in_specs=[_VMEM] * 3,
        out_specs=_VMEM,
        input_output_aliases={0: 0},
    )


def _pfc_pfc_kernel(lmbda, mode, max_post, max_pre, max_bound):
    # Fused sleep-step update:
    #   plastic <- homeostasis(plastic + lmbda * outer(pfc, pfc))
    #   pfc_pfc <- fixed + plastic
    def kernel(plastic_ref, fixed_ref, a_c_ref, b_r_ref, plastic_o, full_o):
        w = plastic_ref[...] + lmbda * (a_c_ref[...] * b_r_ref[...])
        if mode == 'renorm':
            w = _renorm(w, max_post, max_pre)
        elif mode == 'bound':
            w = jnp.minimum(w, max_bound)
        # mode == 'none': plain Hebbian update
        plastic_o[...] = w
        full_o[...] = fixed_ref[...] + w
    return kernel


@functools.lru_cache(maxsize=None)
def _get_pfc_pfc_update(size, lmbda, mode, max_post, max_pre, max_bound):
    return pl.pallas_call(
        _pfc_pfc_kernel(lmbda, mode, max_post, max_pre, max_bound),
        out_shape=(jax.ShapeDtypeStruct((size, size), jnp.float32),
                   jax.ShapeDtypeStruct((size, size), jnp.float32)),
        in_specs=[_VMEM] * 4,
        out_specs=(_VMEM, _VMEM),
        input_output_aliases={0: 0},
    )


# --------------------------------------------------------------------------
# Static per-phase configuration (hashable -> jit static arg)
# --------------------------------------------------------------------------

class _Cfg(NamedTuple):
    sen_size: int
    lec_size: int
    mec_size: int
    hpc_size: int
    pfc_size: int
    pfc_regions: tuple
    pfc_sparsity: tuple
    sleep_pfc_sparsity: tuple
    lec_topk: int
    mec_topk: int
    hpc_topk: int
    gamma_lec_sen: float
    gamma_mec_pfc: float
    gamma_hpc_hpc: float
    gamma_pfc_pfc: float
    gamma_pfc_lec: float
    gamma_pfc_mec: float
    lmbda_hpc_hpc: float
    lmbda_pfc_pfc: float
    lmbda_pfc_lec: float
    lmbda_mec_pfc: float
    lmbda_pfc_mec: float
    beta_hpc: float
    homeostasis: str
    max_connectivity: float
    max_post_pfc_pfc: float
    max_pre_pfc_pfc: float
    max_post_mec_pfc: float
    max_pre_mec_pfc: float
    max_post_pfc_mec: float
    max_pre_pfc_mec: float
    random_hpc_sparsity: float
    random_pfc_sparsity: float
    pattern_complete_iterations: int
    sleep_time: int
    is_baby: bool
    is_adult: bool
    is_pre_adolescent: bool
    frozen: bool


# --------------------------------------------------------------------------
# Activation / pattern-completion helpers (plain JAX glue, run inside the jit)
# --------------------------------------------------------------------------

def _topk_binary(x, k):
    k = int(k)
    if k <= 0:
        return jnp.zeros_like(x)
    _, idx = lax.top_k(x, k)
    out = jnp.zeros_like(x)
    if x.ndim == 1:
        return out.at[idx].set(1.0)
    rows = jnp.arange(x.shape[0])[:, None]
    return out.at[rows, idx].set(1.0)


def _activation_pfc(cfg, key, x, sparsities):
    # NB: the reference's `top_k` argument is ignored (exactly as in torch).
    noise = jax.random.normal(key, x.shape, jnp.float32)
    if x.ndim == 1:
        rng = jnp.max(x) - jnp.min(x)
    else:
        rng = (jnp.max(x, axis=-1, keepdims=True)
               - jnp.min(x, axis=-1, keepdims=True))
    xn = x + (1e-10 + rng) / 100.0 * noise
    out = jnp.zeros_like(x)
    for ri, (start, stop) in enumerate(cfg.pfc_regions):
        size = stop - start
        k = int(size * sparsities[ri])
        seg_bin = _topk_binary(xn[..., start:stop], k)
        out = out.at[..., start:stop].set(seg_bin)
    return out


def _pattern_complete_pfc(cfg, key, pfc_pfc, h, sparsities, num_iterations):
    for _ in range(int(num_iterations)):
        key, sub = jax.random.split(key)
        recur = scaled_linear(h, pfc_pfc, cfg.gamma_pfc_pfc)
        h = _activation_pfc(cfg, sub, recur, sparsities)
    return h


def _pattern_complete_hpc(cfg, hpc_hpc, h):
    # TODO(synk): the h_0 is None branch of the reference calls a weight tensor
    # as a module (dead code); only the h_0-given path is implemented.
    for _ in range(int(cfg.pattern_complete_iterations)):
        recur = scaled_linear(h, hpc_hpc, cfg.gamma_hpc_hpc)
        h = cfg.beta_hpc * h + _topk_binary(recur, cfg.hpc_topk)
    return h


# --------------------------------------------------------------------------
# Whole-phase jitted functions (one device dispatch per phase)
# --------------------------------------------------------------------------

@functools.partial(jax.jit, static_argnums=(0,))
def _process_input_jit(cfg, key, inp, lec_sen, pfc_pfc, mec_pfc,
                       hpc_hpc, pfc_lec, pfc_mec):
    T = inp.shape[0]
    # ---- time-parallel activities: one batched Pallas GEMM per stage ----
    lec_hat_all = scaled_linear(inp, lec_sen, cfg.gamma_lec_sen)        # (T,lec)
    lec_all = _topk_binary(lec_hat_all, cfg.lec_topk)
    pfc_hat_all = jnp.zeros((T, cfg.pfc_size), jnp.float32)
    pfc_hat_all = pfc_hat_all.at[:, :cfg.sen_size].set(inp)
    key, k0, k1, k2 = jax.random.split(key, 4)
    pfc_all = _activation_pfc(cfg, k0, pfc_hat_all, cfg.pfc_sparsity)
    if cfg.is_baby:
        mec_hat_all = jnp.zeros((T, cfg.mec_size), jnp.float32)
        mec_all = jnp.zeros((T, cfg.mec_size), jnp.float32)
    else:
        # pfc_pfc / mec_pfc are constant during waking, so pattern completion
        # and the MEC drive are batched over all timesteps (MXU sees (T,in)).
        pfc_all = _pattern_complete_pfc(cfg, k1, pfc_pfc, pfc_all,
                                        cfg.pfc_sparsity,
                                        cfg.pattern_complete_iterations)
        pfc_all = _activation_pfc(cfg, k2, pfc_all, cfg.pfc_sparsity)
        mec_hat_all = scaled_linear(pfc_all, mec_pfc, cfg.gamma_mec_pfc)
        mec_all = _topk_binary(mec_hat_all, cfg.mec_topk)
    hpc_all = jnp.concatenate([lec_all, mec_all], axis=1)   # hpc = [lec | mec]

    steps = {'lec_hat': lec_hat_all, 'lec': lec_all, 'pfc_hat': pfc_hat_all,
             'pfc': pfc_all, 'mec_hat': mec_hat_all, 'mec': mec_all,
             'hpc': hpc_all}
    if cfg.frozen:
        return steps

    # ---- sequential Hebbian accumulation (fused Pallas kernels in a scan) ----
    hl_fn = _get_hebb_hpc_lec(cfg.hpc_size, cfg.pfc_size, cfg.lec_size,
                              cfg.lmbda_hpc_hpc, cfg.lmbda_pfc_lec)
    do_pfc_mec = (not cfg.is_baby) and cfg.is_adult
    if do_pfc_mec:
        pm_fn = _get_hebb_renorm(cfg.pfc_size, cfg.mec_size, cfg.lmbda_pfc_mec,
                                 cfg.max_post_pfc_mec, cfg.max_pre_pfc_mec)

    def step(carry, xs):
        whh, wpl, wpm = carry
        hpc_t, pfc_t, lec_t, mec_t = xs
        ys = {}
        if do_pfc_mec:
            wpm = pm_fn(wpm, pfc_t.reshape(-1, 1), mec_t.reshape(1, -1))
            ys['pfc_mec'] = wpm
        whh, wpl = hl_fn(whh, wpl,
                         hpc_t.reshape(-1, 1), hpc_t.reshape(1, -1),
                         pfc_t.reshape(-1, 1), lec_t.reshape(1, -1))
        ys['hpc_hpc'] = whh
        ys['pfc_lec'] = wpl
        return (whh, wpl, wpm), ys

    _, ws = lax.scan(step, (hpc_hpc, pfc_lec, pfc_mec),
                     (hpc_all, pfc_all, lec_all, mec_all))
    steps.update(ws)
    return steps


@functools.partial(jax.jit, static_argnums=(0,))
def _sleep_jit(cfg, key, hpc_hpc, pfc_lec, pfc_mec, pfc_pfc_fixed,
               pfc_pfc_plastic, mec_pfc):
    T = cfg.sleep_time
    key, k_h0, k_steps = jax.random.split(key, 3)
    # ---- batched HPC replay: hpc_hpc is constant during sleep ----
    h0_all = jax.random.bernoulli(
        k_h0, cfg.random_hpc_sparsity, (T, cfg.hpc_size)).astype(jnp.float32)
    hpc_all = _pattern_complete_hpc(cfg, hpc_hpc, h0_all)
    hpc_all = _topk_binary(hpc_all, cfg.hpc_topk)
    # ---- pfc_hat drive: one GEMM against pre-scaled / pre-concatenated
    #      weights (pfc_lec / pfc_mec are constant during sleep) ----
    if cfg.is_pre_adolescent:
        drive_x = hpc_all[:, :cfg.lec_size]
        drive_w = cfg.gamma_pfc_lec * pfc_lec
    else:
        drive_x = hpc_all
        drive_w = jnp.concatenate(
            [cfg.gamma_pfc_lec * pfc_lec, cfg.gamma_pfc_mec * pfc_mec], axis=1)
    pfc_hat_all = scaled_linear(drive_x, drive_w, 1.0)
    step_keys = jax.random.split(k_steps, T)

    pfn = _get_pfc_pfc_update(cfg.pfc_size, cfg.lmbda_pfc_pfc, cfg.homeostasis,
                              cfg.max_post_pfc_pfc, cfg.max_pre_pfc_pfc,
                              cfg.max_connectivity / 100.0)
    rfn = _get_hebb_renorm(cfg.mec_size, cfg.pfc_size, cfg.lmbda_mec_pfc,
                           cfg.max_post_mec_pfc, cfg.max_pre_mec_pfc)

    # pfc_pfc / mec_pfc are updated every sleep step and read in the same step,
    # so this part stays sequential (but inside the single jit / scan).
    def step(carry, xs):
        plastic, wmp = carry
        pfc_hat_t, k = xs
        k1, k2, k3, k4 = jax.random.split(k, 4)
        # NOTE: bakes one pfc_sparsity for this initial activation; the
        # reference would use the pre-sleep value only on step 0 if it
        # differed from [0.1, 0.1].
        pfc_t = _activation_pfc(cfg, k1, pfc_hat_t, cfg.pfc_sparsity)
        plastic, full = pfn(plastic, pfc_pfc_fixed,
                            pfc_t.reshape(-1, 1), pfc_t.reshape(1, -1))
        if cfg.is_baby:
            mec_hat_t = jnp.zeros((cfg.mec_size,), jnp.float32)
            mec_t = jnp.zeros((cfg.mec_size,), jnp.float32)
        else:
            h0 = jax.random.bernoulli(
                k2, cfg.random_pfc_sparsity,
                (cfg.pfc_size,)).astype(jnp.float32)
            pfc_t = _pattern_complete_pfc(cfg, k3, full, h0,
                                          cfg.sleep_pfc_sparsity,
                                          cfg.pattern_complete_iterations)
            pfc_t = _activation_pfc(cfg, k4, pfc_t, cfg.sleep_pfc_sparsity)
            mec_hat_t = scaled_linear(pfc_t, wmp, cfg.gamma_mec_pfc)
            mec_t = _topk_binary(mec_hat_t, 5)
            wmp = rfn(wmp, mec_t.reshape(-1, 1), pfc_t.reshape(1, -1))
        ys = {'pfc': pfc_t, 'mec_hat': mec_hat_t, 'mec': mec_t,
              'pfc_pfc_plastic': plastic, 'pfc_pfc': full, 'mec_pfc': wmp}
        return (plastic, wmp), ys

    _, ys = lax.scan(step, (pfc_pfc_plastic, mec_pfc),
                     (pfc_hat_all, step_keys))
    steps = dict(ys)
    steps['hpc'] = hpc_all
    steps['pfc_hat'] = pfc_hat_all
    return steps


# --------------------------------------------------------------------------
# Network (state machine mirroring the PyTorch module; glue on the host)
# --------------------------------------------------------------------------

def _linear_weight_init(key, out_dim, in_dim):
    # deterministic stand-in for nn.Linear default init (uniform +-1/sqrt(in))
    bound = 1.0 / math.sqrt(in_dim)
    return jax.random.uniform(key, (out_dim, in_dim), jnp.float32,
                              minval=-bound, maxval=bound)


class SESNetworkPallas:

    def __init__(self, net_params, rec_params, key):
        self._key = key
        self.init_network(net_params)
        self.init_recordings(rec_params)

    # ---------------- RNG helper ----------------
    def _next_key(self):
        self._key, sub = jax.random.split(self._key)
        return sub

    # ---------------- init ----------------
    def init_network(self, net_params):
        for k, v in net_params.items():
            setattr(self, k, v)
        self.frozen = False
        self.beta_hpc = math.exp(-1.0 / self.tau_hpc)
        self.beta_pfc = math.exp(-1.0 / self.tau_pfc)
        self.hpc_pattern_width = int(math.sqrt(self.hpc_size))
        self.pfc_pattern_width = int(math.sqrt(self.pfc_size))

        f32 = jnp.float32
        self.lec = jnp.zeros(self.lec_size, f32)
        self.lec_hat = jnp.zeros(self.lec_size, f32)
        self.mec_hat = jnp.zeros(self.mec_size, f32)
        self.mec = jnp.zeros(self.mec_size, f32)
        self.hpc = jnp.zeros(self.hpc_size, f32)
        self.pfc = jnp.zeros(self.pfc_size, f32)
        self.pfc_hat = jnp.zeros(self.pfc_size, f32)

        self.hpc_hpc_sparsity_mask = (
            jax.random.uniform(self._next_key(), (self.hpc_size, self.hpc_size))
            < self.hpc_hpc_sparsity).astype(f32)
        self.hpc_hpc = (_linear_weight_init(self._next_key(),
                                            self.hpc_size, self.hpc_size)
                        * self.hpc_hpc_g * self.hpc_hpc_sparsity_mask)
        self.pfc_pfc_sparsity_mask = (
            jax.random.uniform(self._next_key(), (self.pfc_size, self.pfc_size))
            < self.pfc_pfc_sparsity).astype(f32)
        self.pfc_pfc_fixed = (_linear_weight_init(self._next_key(),
                                                  self.pfc_size, self.pfc_size)
                              * self.pfc_pfc_g * self.pfc_pfc_sparsity_mask)
        self.pfc_pfc_plastic = jnp.zeros((self.pfc_size, self.pfc_size), f32)
        self.pfc_pfc = self.pfc_pfc_fixed + self.pfc_pfc_plastic
        self.pfc_lec = jnp.zeros((self.pfc_size, self.lec_size), f32)
        self.lec_sen = _linear_weight_init(self._next_key(),
                                           self.lec_size, self.sen_size)
        self.pfc_sen = jnp.eye(self.pfc_size, dtype=f32)
        self.pfc_mec = jnp.zeros((self.pfc_size, self.mec_size), f32)
        self.mec_pfc = _linear_weight_init(self._next_key(),
                                           self.mec_size, self.pfc_size)

        inf = float("inf")
        self.max_pre_pfc_pfc_connectivity = (
            1 / self.eta_pre_pfc_pfc * self.max_connectivity
            if self.eta_pre_pfc_pfc != 0 else inf)
        self.max_post_pfc_pfc_connectivity = (
            1 / (1 - self.eta_pre_pfc_pfc) * self.max_connectivity
            if self.eta_pre_pfc_pfc != 1 else inf)
        self.max_pre_mec_pfc_connectivity = (
            0.1 * (1 / self.eta_pre_mec_pfc) * self.max_connectivity
            if self.eta_pre_mec_pfc != 0 else inf)
        self.max_post_mec_pfc_connectivity = (
            0.1 * (1 / (1 - self.eta_pre_mec_pfc)) * self.max_connectivity
            if self.eta_pre_mec_pfc != 1 else inf)
        self.max_pre_pfc_mec_connectivity = (
            1 / self.eta_pre_pfc_mec * self.max_connectivity
            if self.eta_pre_pfc_mec != 0 else inf)
        self.max_post_pfc_mec_connectivity = (
            0.1 * (1 / (1 - self.eta_pre_pfc_mec)) * self.max_connectivity
            if self.eta_pre_pfc_mec != 1 else inf)

        self.time_index = 0
        self.baby_days = 0
        self.adolescent_days = 0

    def init_recordings(self, rec_params):
        self.activity_recordings = {
            r: [getattr(self, r)] for r in rec_params['regions']}
        self.activity_recordings_rate = rec_params['rate_activity']
        self.activity_recordings_time = []
        self.connectivity_recordings = {
            c: [getattr(self, c)] for c in rec_params['connections']}
        self.connectivity_recordings_time = []
        self.connectivity_recordings_rate = rec_params['rate_connectivity']

    # ---------------- static per-phase config ----------------
    def _cfg(self):
        mode = self.homeostasis
        if mode not in ('none', 'bound', 'renorm'):
            mode = 'none'
        is_baby = self.baby_days < self.total_baby_days
        hpc_topk = (int(self.lec_size * self.lec_sparsity) if is_baby
                    else int(self.lec_size * self.lec_sparsity
                             + self.mec_size * self.mec_sparsity))
        return _Cfg(
            sen_size=int(self.sen_size), lec_size=int(self.lec_size),
            mec_size=int(self.mec_size), hpc_size=int(self.hpc_size),
            pfc_size=int(self.pfc_size),
            pfc_regions=tuple((int(a), int(b)) for a, b in self.pfc_regions),
            pfc_sparsity=tuple(float(s) for s in self.pfc_sparsity),
            sleep_pfc_sparsity=(0.05, 0.1),
            lec_topk=int(self.lec_size * self.lec_sparsity),
            mec_topk=int(self.mec_size * self.mec_sparsity),
            hpc_topk=int(hpc_topk),
            gamma_lec_sen=float(self.gamma_lec_sen),
            gamma_mec_pfc=float(self.gamma_mec_pfc),
            gamma_hpc_hpc=float(self.gamma_hpc_hpc),
            gamma_pfc_pfc=float(self.gamma_pfc_pfc),
            gamma_pfc_lec=float(self.gamma_pfc_lec),
            gamma_pfc_mec=float(self.gamma_pfc_mec),
            lmbda_hpc_hpc=float(self.lmbda_hpc_hpc),
            lmbda_pfc_pfc=float(self.lmbda_pfc_pfc),
            lmbda_pfc_lec=float(self.lmbda_pfc_lec),
            lmbda_mec_pfc=float(self.lmbda_mec_pfc),
            lmbda_pfc_mec=float(self.lmbda_pfc_mec),
            beta_hpc=float(self.beta_hpc),
            homeostasis=mode,
            max_connectivity=float(self.max_connectivity),
            max_post_pfc_pfc=float(self.max_post_pfc_pfc_connectivity),
            max_pre_pfc_pfc=float(self.max_pre_pfc_pfc_connectivity),
            max_post_mec_pfc=float(self.max_post_mec_pfc_connectivity),
            max_pre_mec_pfc=float(self.max_pre_mec_pfc_connectivity),
            max_post_pfc_mec=float(self.max_post_pfc_mec_connectivity),
            max_pre_pfc_mec=float(self.max_pre_pfc_mec_connectivity),
            random_hpc_sparsity=float(self.random_hpc_sparsity),
            random_pfc_sparsity=float(self.random_pfc_sparsity),
            pattern_complete_iterations=int(self.pattern_complete_iterations),
            sleep_time=int(self.sleep_time),
            is_baby=bool(is_baby),
            is_adult=bool(self.adolescent_days > self.total_adolescent_days),
            is_pre_adolescent=bool(
                self.adolescent_days < self.total_adolescent_days),
            frozen=bool(self.frozen),
        )

    # ---------------- daily loop ----------------
    def daily_reset(self):
        self.hpc_hpc = jnp.zeros((self.hpc_size, self.hpc_size), jnp.float32)
        self.hpc = jnp.zeros(self.hpc_size, jnp.float32)
        self.pfc_lec = jnp.zeros((self.pfc_size, self.lec_size), jnp.float32)

    def process_input(self, inp, test=False):
        inp = jnp.asarray(inp, jnp.float32)
        T = int(inp.shape[0])
        if T == 0:
            return
        cfg = self._cfg()
        steps = _process_input_jit(cfg, self._next_key(), inp, self.lec_sen,
                                   self.pfc_pfc, self.mec_pfc, self.hpc_hpc,
                                   self.pfc_lec, self.pfc_mec)
        self._apply_phase(T, steps)

    def sleep(self):
        T = int(self.sleep_time)
        if T == 0:
            return
        if self.homeostasis not in ('none', 'bound', 'renorm'):
            print('This type of homeostatic plasticity is not implemented')
        cfg = self._cfg()
        steps = _sleep_jit(cfg, self._next_key(), self.hpc_hpc, self.pfc_lec,
                           self.pfc_mec, self.pfc_pfc_fixed,
                           self.pfc_pfc_plastic, self.mec_pfc)
        if not cfg.is_baby:
            # the reference restores pfc_sparsity to [0.1, 0.1] after each
            # sleep step's pattern completion.
            self.pfc_sparsity = [0.1, 0.1]
        self._apply_phase(T, steps)

    # ---------------- per-phase bookkeeping (host glue) ----------------
    def _apply_phase(self, T, steps):
        # final per-step values become the live attributes
        for name, arr in steps.items():
            setattr(self, name, arr[T - 1])
        # recordings: changed quantities come from the per-step stacks,
        # phase-constant ones from the (unchanged) live attributes.
        steps_host = jax.device_get(steps)
        for t in range(T):
            self.time_index += 1
            if self.time_index % self.activity_recordings_rate == 0:
                for region in self.activity_recordings:
                    val = (steps_host[region][t] if region in steps_host
                           else getattr(self, region))
                    self.activity_recordings[region].append(val)
                    self.activity_recordings_time.append(self.time_index)
            if self.time_index % self.connectivity_recordings_rate == 0:
                for conn in self.connectivity_recordings:
                    val = (steps_host[conn][t] if conn in steps_host
                           else getattr(self, conn))
                    self.connectivity_recordings[conn].append(val)
                    self.connectivity_recordings_time.append(self.time_index)

    def forward(self, inp, test=False):
        self.daily_reset()
        self.process_input(inp, test)
        if not self.frozen:
            self.sleep()
        self.baby_days += 1
        self.adolescent_days += 1


# --------------------------------------------------------------------------

if __name__ == "__main__":
    key = jax.random.PRNGKey(0)

    net_params = dict(
        sen_size=32, lec_size=32, mec_size=16, hpc_size=48, pfc_size=64,
        pfc_regions=[(0, 32), (32, 64)],           # contiguous PFC regions
        lec_sparsity=0.25, mec_sparsity=0.25, pfc_sparsity=[0.1, 0.1],
        hpc_hpc_sparsity=0.5, pfc_pfc_sparsity=0.5,
        hpc_hpc_g=1.0, pfc_pfc_g=1.0,
        tau_hpc=3.0, tau_pfc=3.0,
        gamma_lec_sen=1.0, gamma_mec_pfc=1.0, gamma_hpc_hpc=1.0,
        gamma_pfc_pfc=1.0, gamma_pfc_lec=1.0, gamma_pfc_mec=1.0,
        lmbda_hpc_hpc=0.1, lmbda_pfc_pfc=0.1, lmbda_pfc_lec=0.1,
        lmbda_mec_pfc=0.1, lmbda_pfc_mec=0.1,
        eta_pre_pfc_pfc=0.5, eta_pre_mec_pfc=0.5, eta_pre_pfc_mec=0.5,
        max_connectivity=1.0, homeostasis='renorm',
        random_hpc_sparsity=0.1, random_pfc_sparsity=0.1,
        sleep_time=2, pattern_complete_iterations=2,
        total_baby_days=0, total_adolescent_days=0,
    )
    rec_params = dict(regions=['hpc', 'pfc', 'mec'],
                      connections=['hpc_hpc', 'pfc_pfc', 'mec_pfc'],
                      rate_activity=1, rate_connectivity=1)

    key, k_init, k_in = jax.random.split(key, 3)
    net = SESNetworkPallas(net_params, rec_params, k_init)

    # input: (timesteps, sen_size)
    x = jax.random.normal(k_in, (4, net_params['sen_size']), dtype=jnp.float32)

    net.forward(x)

    jax.block_until_ready(net.pfc_pfc)
    jax.block_until_ready(net.pfc_pfc_plastic)
    jax.block_until_ready(net.hpc_hpc)
    jax.block_until_ready(net.mec_pfc)
    jax.block_until_ready(net.pfc_lec)
    jax.block_until_ready(net.hpc)
    jax.block_until_ready(net.pfc)
    jax.block_until_ready(net.mec)
    print("KERNEL_OK")
</pallas_src>

<mosaic_0001>
module attributes {stable_mosaic.version = 11 : i64} {
  func.func @kernel(%arg0: memref<4x32xf32, #tpu.memory_space<vmem>>, %arg1: memref<32x32xf32, #tpu.memory_space<vmem>>, %arg2: memref<4x32xf32, #tpu.memory_space<vmem>>) attributes {dimension_semantics = [], scalar_prefetch = 0 : i64, scratch_operands = 0 : i64, tpu.core_type = #tpu.core_type<tc>} {
    %c0 = arith.constant 0 : index
    %c0_0 = arith.constant 0 : index
    %0 = vector.load %arg0[%c0, %c0_0] : memref<4x32xf32, #tpu.memory_space<vmem>>, vector<4x32xf32>
    %c0_1 = arith.constant 0 : index
    %c0_2 = arith.constant 0 : index
    %1 = vector.load %arg1[%c0_1, %c0_2] : memref<32x32xf32, #tpu.memory_space<vmem>>, vector<32x32xf32>
    %cst = arith.constant dense<0.000000e+00> : vector<4x32xf32>
    %2 = tpu.matmul %0, %1, %cst {dimension_numbers = #tpu.dot_dimension_numbers<[1], [1], [0], [0], [0, 0, 1, 0], [], []>} : vector<4x32xf32>, vector<32x32xf32>, vector<4x32xf32> -> vector<4x32xf32>
    %cst_3 = arith.constant 1.000000e+00 : f32
    %3 = vector.broadcast %cst_3 : f32 to vector<4x32xf32>
    %4 = arith.mulf %3, %2 : vector<4x32xf32>
    %c0_4 = arith.constant 0 : index
    %c0_5 = arith.constant 0 : index
    %5 = vector.load %arg2[%c0_4, %c0_5] : memref<4x32xf32, #tpu.memory_space<vmem>>, vector<4x32xf32>
    tpu.vector_store %arg2[%c0_4, %c0_5], %4 {strides = array<i32>} : memref<4x32xf32, #tpu.memory_space<vmem>>, vector<4x32xf32>,
    return
  }
}

module attributes {stable_mosaic.version = 11 : i64} {
  func.func @kernel(%arg0: memref<4x64xf32, #tpu.memory_space<vmem>>, %arg1: memref<64x64xf32, #tpu.memory_space<vmem>>, %arg2: memref<4x64xf32, #tpu.memory_space<vmem>>) attributes {dimension_semantics = [], scalar_prefetch = 0 : i64, scratch_operands = 0 : i64, tpu.core_type = #tpu.core_type<tc>} {
    %c0 = arith.constant 0 : index
    %c0_0 = arith.constant 0 : index
    %0 = vector.load %arg0[%c0, %c0_0] : memref<4x64xf32, #tpu.memory_space<vmem>>, vector<4x64xf32>
    %c0_1 = arith.constant 0 : index
    %c0_2 = arith.constant 0 : index
    %1 = vector.load %arg1[%c0_1, %c0_2] : memref<64x64xf32, #tpu.memory_space<vmem>>, vector<64x64xf32>
    %cst = arith.constant dense<0.000000e+00> : vector<4x64xf32>
    %2 = tpu.matmul %0, %1, %cst {dimension_numbers = #tpu.dot_dimension_numbers<[1], [1], [0], [0], [0, 0, 1, 0], [], []>} : vector<4x64xf32>, vector<64x64xf32>, vector<4x64xf32> -> vector<4x64xf32>
    %cst_3 = arith.constant 1.000000e+00 : f32
    %3 = vector.broadcast %cst_3 : f32 to vector<4x64xf32>
    %4 = arith.mulf %3, %2 : vector<4x64xf32>
    %c0_4 = arith.constant 0 : index
    %c0_5 = arith.constant 0 : index
    %5 = vector.load %arg2[%c0_4, %c0_5] : memref<4x64xf32, #tpu.memory_space<vmem>>, vector<4x64xf32>
    tpu.vector_store %arg2[%c0_4, %c0_5], %4 {strides = array<i32>} : memref<4x64xf32, #tpu.memory_space<vmem>>, vector<4x64xf32>,
    return
  }
}

module attributes {stable_mosaic.version = 11 : i64} {
  func.func @kernel(%arg0: memref<4x64xf32, #tpu.memory_space<vmem>>, %arg1: memref<16x64xf32, #tpu.memory_space<vmem>>, %arg2: memref<4x16xf32, #tpu.memory_space<vmem>>) attributes {dimension_semantics = [], scalar_prefetch = 0 : i64, scratch_operands = 0 : i64, tpu.core_type = #tpu.core_type<tc>} {
    %c0 = arith.constant 0 : index
    %c0_0 = arith.constant 0 : index
    %0 = vector.load %arg0[%c0, %c0_0] : memref<4x64xf32, #tpu.memory_space<vmem>>, vector<4x64xf32>
    %c0_1 = arith.constant 0 : index
    %c0_2 = arith.constant 0 : index
    %1 = vector.load %arg1[%c0_1, %c0_2] : memref<16x64xf32, #tpu.memory_space<vmem>>, vector<16x64xf32>
    %cst = arith.constant dense<0.000000e+00> : vector<4x16xf32>
    %2 = tpu.matmul %0, %1, %cst {dimension_numbers = #tpu.dot_dimension_numbers<[1], [1], [0], [0], [0, 0, 1, 0], [], []>} : vector<4x64xf32>, vector<16x64xf32>, vector<4x16xf32> -> vector<4x16xf32>
    %cst_3 = arith.constant 1.000000e+00 : f32
    %3 = vector.broadcast %cst_3 : f32 to vector<4x16xf32>
    %4 = arith.mulf %3, %2 : vector<4x16xf32>
    %c0_4 = arith.constant 0 : index
    %c0_5 = arith.constant 0 : index
    %5 = vector.load %arg2[%c0_4, %c0_5] : memref<4x16xf32, #tpu.memory_space<vmem>>, vector<4x16xf32>
    tpu.vector_store %arg2[%c0_4, %c0_5], %4 {strides = array<i32>} : memref<4x16xf32, #tpu.memory_space<vmem>>, vector<4x16xf32>,
    return
  }
}

module attributes {stable_mosaic.version = 11 : i64} {
  func.func @kernel(%arg0: memref<48x48xf32, #tpu.memory_space<vmem>>, %arg1: memref<64x32xf32, #tpu.memory_space<vmem>>, %arg2: memref<48x1xf32, #tpu.memory_space<vmem>>, %arg3: memref<1x48xf32, #tpu.memory_space<vmem>>, %arg4: memref<64x1xf32, #tpu.memory_space<vmem>>, %arg5: memref<1x32xf32, #tpu.memory_space<vmem>>, %arg6: memref<48x48xf32, #tpu.memory_space<vmem>>, %arg7: memref<64x32xf32, #tpu.memory_space<vmem>>) attributes {dimension_semantics = [], scalar_prefetch = 0 : i64, scratch_operands = 0 : i64, tpu.core_type = #tpu.core_type<tc>} {
    %0 = tpu.iota {dimensions = array<i32: 0>} : vector<48x48xi32>
    %1 = tpu.iota {dimensions = array<i32: 1>} : vector<48x48xi32>
    %c0 = arith.constant 0 : index
    %c0_0 = arith.constant 0 : index
    %2 = vector.load %arg0[%c0, %c0_0] : memref<48x48xf32, #tpu.memory_space<vmem>>, vector<48x48xf32>
    %c0_1 = arith.constant 0 : index
    %c0_2 = arith.constant 0 : index
    %3 = vector.load %arg2[%c0_1, %c0_2] : memref<48x1xf32, #tpu.memory_space<vmem>>, vector<48x1xf32>
    %c0_3 = arith.constant 0 : index
    %c0_4 = arith.constant 0 : index
    %4 = vector.load %arg3[%c0_3, %c0_4] : memref<1x48xf32, #tpu.memory_space<vmem>>, vector<1x48xf32>
    %5 = vector.broadcast %3 : vector<48x1xf32> to vector<48x48xf32>
    %6 = vector.broadcast %4 : vector<1x48xf32> to vector<48x48xf32>
    %7 = arith.mulf %5, %6 : vector<48x48xf32>
    %cst = arith.constant 1.000000e-01 : f32
    %8 = vector.broadcast %cst : f32 to vector<48x48xf32>
    %9 = arith.mulf %8, %7 : vector<48x48xf32>
    %10 = arith.addf %2, %9 : vector<48x48xf32>
    %11 = arith.cmpi eq, %0, %1 : vector<48x48xi32>
    %cst_5 = arith.constant 0.000000e+00 : f32
    %12 = vector.broadcast %cst_5 : f32 to vector<48x48xf32>
    %13 = arith.select %11, %12, %10 : vector<48x48xi1>, vector<48x48xf32>
    %c0_6 = arith.constant 0 : index
    %c0_7 = arith.constant 0 : index
    %14 = vector.load %arg6[%c0_6, %c0_7] : memref<48x48xf32, #tpu.memory_space<vmem>>, vector<48x48xf32>
    tpu.vector_store %arg6[%c0_6, %c0_7], %13 {strides = array<i32>} : memref<48x48xf32, #tpu.memory_space<vmem>>, vector<48x48xf32>,
    %c0_8 = arith.constant 0 : index
    %c0_9 = arith.constant 0 : index
    %15 = vector.load %arg1[%c0_8, %c0_9] : memref<64x32xf32, #tpu.memory_space<vmem>>, vector<64x32xf32>
    %c0_10 = arith.constant 0 : index
    %c0_11 = arith.constant 0 : index
    %16 = vector.load %arg4[%c0_10, %c0_11] : memref<64x1xf32, #tpu.memory_space<vmem>>, vector<64x1xf32>
    %c0_12 = arith.constant 0 : index
    %c0_13 = arith.constant 0 : index
    %17 = vector.load %arg5[%c0_12, %c0_13] : memref<1x32xf32, #tpu.memory_space<vmem>>, vector<1x32xf32>
    %18 = vector.broadcast %16 : vector<64x1xf32> to vector<64x32xf32>
    %19 = vector.broadcast %17 : vector<1x32xf32> to vector<64x32xf32>
    %20 = arith.mulf %18, %19 : vector<64x32xf32>
    %cst_14 = arith.constant 1.000000e-01 : f32
    %21 = vector.broadcast %cst_14 : f32 to vector<64x32xf32>
    %22 = arith.mulf %21, %20 : vector<64x32xf32>
    %23 = arith.addf %15, %22 : vector<64x32xf32>
    %c0_15 = arith.constant 0 : index
    %c0_16 = arith.constant 0 : index
    %24 = vector.load %arg7[%c0_15, %c0_16] : memref<64x32xf32, #tpu.memory_space<vmem>>, vector<64x32xf32>
    tpu.vector_store %arg7[%c0_15, %c0_16], %23 {strides = array<i32>} : memref<64x32xf32, #tpu.memory_space<vmem>>, vector<64x32xf32>,
    return
  }
}

</mosaic_0001>

<bundles_post_ra>
// kernel: _process_input_jit.6
= control target key start
LH: loop header
LB: loop body
LE: loop exit
PB: predicated region body
PF: predicated region fallthrough
CT: control target
= control target key end

     0   :  { %vm16_vm0 = vcmask 261120   ;;  %vm52_vm1 = vcmask 257024   ;;  %s96_s1 = inlined_call_operand.vmem [shape: f32[32,32], index: 1, kind: input, shape index: {}]   ;;  %s97_s0 = inlined_call_operand.vmem [shape: f32[4,32], index: 0, kind: input, shape index: {}]   ;;  %s98_s2 = inlined_call_operand.vmem [shape: f32[4,32], index: 2, kind: output, shape index: {}]  }
   0x1   :  { %v15_v0 = vld [vmem:[%s96_s1 + $0x18] sm:$0xff]  ;;  %v14_v1 = vld [vmem:[%s96_s1 + $0x10] sm:$0xff]  ;;  %v13_v2 = vld [vmem:[%s96_s1 + $0x8] sm:$0xff] }
   0x2   :  { %58 = vmatpush.xpose.msk.msra.mxu0 %vm16_vm0, %v15_v0  ;;  %v12_v3 = vld [vmem:[%s96_s1] sm:$0xff] }
   0x3   :  { %v11_v4 = vld [vmem:[%s97_s0] sm:$0xf] }
   0x6   :  { %59 = vmatpush.xpose.msk.msra.mxu0 %vm16_vm0, %v14_v1 }
   0xa   :  { %60 = vmatpush.xpose.msk.msra.mxu0 %vm16_vm0, %v13_v2 }
   0xe   :  { %61 = vmatpush.xpose.msk.msra.mxu0 %vm16_vm0, %v12_v3 }
  0x11   :  { %62 = vmatmul.msk.f32.vlgmr.msra.gmra.mxu0 %vm16_vm0, %v11_v4 }
  0x8e   :  { %v49_v5 = vpop.f32.mrf.mxu0 }
  0x8f   :  { %53 = vst.msk [vmem:[%s98_s2] sm:$0xf] %vm52_vm1, %v49_v5 }

// kernel: _process_input_jit.7
= control target key start
LH: loop header
LB: loop body
LE: loop exit
PB: predicated region body
PF: predicated region fallthrough
CT: control target
= control target key end

     0   :  { %vm20_vm0 = vcmask 523264   ;;  %vm68_vm1 = vcmask 519168   ;;  %s137_s1 = inlined_call_operand.vmem [shape: f32[64,64], index: 1, kind: input, shape index: {}]   ;;  %s138_s0 = inlined_call_operand.vmem [shape: f32[4,64], index: 0, kind: input, shape index: {}]   ;;  %s139_s2 = inlined_call_operand.vmem [shape: f32[4,64], index: 2, kind: output, shape index: {}]  }
   0x1   :  { %v19_v0 = vld [vmem:[%s137_s1 + $0x38] sm:$0xff]  ;;  %v18_v1 = vld [vmem:[%s137_s1 + $0x30] sm:$0xff]  ;;  %v17_v2 = vld [vmem:[%s137_s1 + $0x28] sm:$0xff] }
   0x2   :  { %74 = vmatpush.xpose.msk.msra.mxu0 %vm20_vm0, %v19_v0  ;;  %v16_v3 = vld [vmem:[%s137_s1 + $0x20] sm:$0xff]  ;;  %v15_v4 = vld [vmem:[%s137_s1 + $0x18] sm:$0xff]  ;;  %v14_v5 = vld [vmem:[%s137_s1 + $0x10] sm:$0xff] }
   0x3   :  { %v13_v6 = vld [vmem:[%s137_s1 + $0x8] sm:$0xff]  ;;  %v12_v7 = vld [vmem:[%s137_s1] sm:$0xff] }
   0x4   :  { %v11_v8 = vld [vmem:[%s138_s0] sm:$0xf] }
   0x6   :  { %75 = vmatpush.xpose.msk.msra.mxu0 %vm20_vm0, %v18_v1 }
   0xa   :  { %76 = vmatpush.xpose.msk.msra.mxu0 %vm20_vm0, %v17_v2 }
   0xe   :  { %77 = vmatpush.xpose.msk.msra.mxu0 %vm20_vm0, %v16_v3 }
  0x12   :  { %78 = vmatpush.xpose.msk.msra.mxu0 %vm20_vm0, %v15_v4 }
  0x16   :  { %79 = vmatpush.xpose.msk.msra.mxu0 %vm20_vm0, %v14_v5 }
  0x1a   :  { %80 = vmatpush.xpose.msk.msra.mxu0 %vm20_vm0, %v13_v6 }
  0x1e   :  { %81 = vmatpush.xpose.msk.msra.mxu0 %vm20_vm0, %v12_v7 }
  0x21   :  { %82 = vmatmul.msk.f32.vlgmr.msra.gmra.mxu0 %vm20_vm0, %v11_v8 }
  0x9e   :  { %v65_v9 = vpop.f32.mrf.mxu0 }
  0x9f   :  { %69 = vst.msk [vmem:[%s139_s2] sm:$0xf] %vm68_vm1, %v65_v9 }

// kernel: _process_input_jit.9
= control target key start
LH: loop header
LB: loop body
LE: loop exit
PB: predicated region body
PF: predicated region fallthrough
CT: control target
= control target key end

     0   :  { %vm14_vm0 = vcmask 523264   ;;  %vm44_vm1 = vcmask 125952   ;;  %s80_s1 = inlined_call_operand.vmem [shape: f32[16,64], index: 1, kind: input, shape index: {}]   ;;  %s81_s0 = inlined_call_operand.vmem [shape: f32[4,64], index: 0, kind: input, shape index: {}]   ;;  %s82_s2 = inlined_call_operand.vmem [shape: f32[4,16], index: 2, kind: output, shape index: {}]  }
   0x1   :  { %v13_v0 = vld [vmem:[%s80_s1 + $0x8] sm:$0xff]  ;;  %v12_v1 = vld [vmem:[%s80_s1] sm:$0xff] }
   0x2   :  { %50 = vmatpush.xpose.msk.msra.mxu0 %vm14_vm0, %v13_v0  ;;  %v11_v2 = vld [vmem:[%s81_s0] sm:$0xf] }
   0x6   :  { %51 = vmatpush.xpose.msk.msra.mxu0 %vm14_vm0, %v12_v1 }
   0x9   :  { %52 = vmatmul.msk.f32.vlgmr.msra.gmra.mxu0 %vm14_vm0, %v11_v2 }
  0x86   :  { %v41_v3 = vpop.f32.mrf.mxu0 }
  0x87   :  { %45 = vst.msk [vmem:[%s82_s2] sm:$0xf] %vm44_vm1, %v41_v3 }

// kernel: custom-call.21
= control target key start
LH: loop header
LB: loop body
LE: loop exit
PB: predicated region body
PF: predicated region fallthrough
CT: control target
= control target key end

     0   :  { %s6_s0 = inlined_call_operand.hbm [shape: f32[4,64,32], index: 0, kind: output, shape index: {}]  }

// kernel: custom-call.20
= control target key start
LH: loop header
LB: loop body
LE: loop exit
PB: predicated region body
PF: predicated region fallthrough
CT: control target
= control target key end

     0   :  { %s6_s0 = inlined_call_operand.hbm [shape: f32[4,48,48], index: 0, kind: output, shape index: {}]  }

// kernel: closed_call.5
= control target key start
LH: loop header
LB: loop body
LE: loop exit
PB: predicated region body
PF: predicated region fallthrough
CT: control target
= control target key end

     0   :  { %v224_v0 = vmov 0   ;;  %v25_v15 = vlaneseq  ;;  %vm110_vm1 = vcmask 392192   ;;  %vm201_vm3 = vcmask 261120   ;;  %s429_s2 = inlined_call_operand.vmem [shape: f32[48,1], index: 2, kind: input, shape index: {}]   ;;  %s430_s3 = inlined_call_operand.vmem [shape: f32[1,48], index: 3, kind: input, shape index: {}]   ;;  %s431_s5 = inlined_call_operand.vmem [shape: f32[1,32], index: 5, kind: input, shape index: {}]   ;;  %s432_s4 = inlined_call_operand.vmem [shape: f32[64,1], index: 4, kind: input, shape index: {}]   ;;  %s433_s0 = inlined_call_operand.vmem [shape: f32[48,48], index: 0, kind: input, shape index: {}, may-alias: {0,6}]   ;;  %s434_s6 = inlined_call_operand.vmem [shape: f32[48,48], index: 6, kind: output, shape index: {0}, may-alias: {0,6}]   ;;  %s435_s1 = inlined_call_operand.vmem [shape: f32[64,32], index: 1, kind: input, shape index: {}, may-alias: {1,7}]   ;;  %s436_s7 = inlined_call_operand.vmem [shape: f32[64,32], index: 7, kind: output, shape index: {1}, may-alias: {1,7}]  }
   0x1   :  { %220 = vset.pattern.permute.xlu1 %v224_v0  ;;  %219 = vset.pattern.permute.xlu0 %v224_v0  ;;  %v42_v1 = vld [vmem:[%s429_s2 + $0x10] sm:$0xff]  ;;  %v40_v2 = vld [vmem:[%s429_s2] sm:$0xff]  ;;  %v43_v4 = vld [vmem:[%s429_s2 + $0x18] sm:$0xff] }
   0x2   :  { %v44_v3 = vld [vmem:[%s429_s2 + $0x20] sm:$0xff]  ;;  %59 = vperm.xlu1 %220, %v42_v1   ;;  %49 = vperm.xlu0 %219, %v40_v2   ;;  %v41_v5 = vld [vmem:[%s429_s2 + $0x8] sm:$0xff]  ;;  %v127_v9 = vld [vmem:[%s432_s4 + $0x10] sm:$0xff]  ;;  %v26_v16 = vshrl.u32 %v25_v15, 7  ;;  %v310_v21 = vand.u32 127, %v25_v15 }
   0x3   :  { %221 = vset.pattern.permute.xlu2 %v224_v0  ;;  %v45_v6 = vld [vmem:[%s429_s2 + $0x28] sm:$0xff]  ;;  %v125_v8 = vld [vmem:[%s432_s4] sm:$0xff]  ;;  %v128_v11 = vld [vmem:[%s432_s4 + $0x18] sm:$0xff] }
   0x4   :  { %69 = vperm.xlu2 %221, %v44_v3   ;;  %v126_v7 = vld [vmem:[%s432_s4 + $0x8] sm:$0xff]  ;;  %v129_v10 = vld [vmem:[%s432_s4 + $0x20] sm:$0xff]  ;;  %v132_v13 = vld [vmem:[%s432_s4 + $0x38] sm:$0xff]  ;;  %v30_v18 = vadd.s32 32, %v26_v16  ;;  %v31_v26 = vadd.s32 40, %v26_v16  ;;  %v28_v39 = vadd.s32 16, %v26_v16  ;;  %vm98_vm5 = vcmp.eq.s32.totalorder %v26_v16, %v310_v21 }
   0x5   :  { %v130_v12 = vld [vmem:[%s432_s4 + $0x28] sm:$0xff]  ;;  %v131_v14 = vld [vmem:[%s432_s4 + $0x30] sm:$0xff]  ;;  %v222_v17 = vld [vmem:[%s430_s3] ss:$0 sm:$0xff]  ;;  %v29_v57 = vadd.s32 24, %v26_v16  ;;  %v27_v59 = vadd.s32 8, %v26_v16 }
   0x6   :  { %v38_v22 = vld [vmem:[%s433_s0 + $0x20] sm:$0xff]  ;;  %vm102_vm0 = vcmp.eq.s32.totalorder %v30_v18, %v310_v21  ;;  %vm103_vm2 = vcmp.eq.s32.totalorder %v31_v26, %v310_v21  ;;  %v119_v36 = vld [vmem:[%s435_s1 + $0x10] sm:$0xff]  ;;  %vm100_vm4 = vcmp.eq.s32.totalorder %v28_v39, %v310_v21 }
   0x7   :  { %v327_v32 = vld [vmem:[%s431_s5] ss:$0 sm:$0xff]  ;;  %vm101_vm6 = vcmp.eq.s32.totalorder %v29_v57, %v310_v21  ;;  %vm99_vm7 = vcmp.eq.s32.totalorder %v27_v59, %v310_v21 }
   0xa   :  { %64 = vperm.xlu1 %220, %v43_v4   ;;  %54 = vperm.xlu0 %219, %v41_v5  }
   0xc   :  { %74 = vperm.xlu2 %221, %v45_v6  }
  0x12   :  { %141 = vperm.xlu1 %220, %v126_v7   ;;  %136 = vperm.xlu0 %219, %v125_v8  }
  0x14   :  { %146 = vperm.xlu2 %221, %v127_v9  }
  0x1a   :  { %156 = vperm.xlu1 %220, %v129_v10   ;;  %151 = vperm.xlu0 %219, %v128_v11  }
  0x1c   :  { %161 = vperm.xlu2 %221, %v130_v12  }
  0x22   :  { %171 = vperm.xlu1 %220, %v132_v13   ;;  %166 = vperm.xlu0 %219, %v131_v14  }
  0x5e   :  { %v70_v19 = vpop.permute.xlu2 %69 }
  0x5f   :  { %v84_v20 = vmul.f32 %v222_v17, %v70_v19 }
  0x61   :  { %v90_v23 = vmul.f32 0.1, %v84_v20 }
  0x63   :  { %v96_v24 = vadd.f32 %v90_v23, %v38_v22 }
  0x65   :  { %v108_v25 = vsel %vm102_vm0, 0.0, %v96_v24 }
  0x66   :  { %115 = vst.msk [vmem:[%s434_s6 + $0x20] sm:$0xff] %vm110_vm1, %v108_v25  ;;  %v75_v27 = vpop.permute.xlu2 %74 }
  0x67   :  { %v85_v28 = vmul.f32 %v222_v17, %v75_v27 }
  0x69   :  { %v91_v30 = vmul.f32 0.1, %v85_v28 }
  0x6d   :  { %v39_v29 = vld [vmem:[%s433_s0 + $0x28] sm:$0xff] }
  0x6e   :  { %v97_v31 = vadd.f32 %v91_v30, %v39_v29  ;;  %v147_v34 = vpop.permute.xlu2 %146 }
  0x6f   :  { %v179_v35 = vmul.f32 %v327_v32, %v147_v34 }
  0x70   :  { %v109_v33 = vsel %vm103_vm2, 0.0, %v97_v31 }
  0x71   :  { %116 = vst.msk [vmem:[%s434_s6 + $0x28] sm:$0xff] %vm110_vm1, %v109_v33  ;;  %v187_v37 = vmul.f32 0.1, %v179_v35 }
  0x73   :  { %v195_v38 = vadd.f32 %v187_v37, %v119_v36 }
  0x74   :  { %v60_v40 = vpop.permute.xlu1 %59  ;;  %v50_v41 = vpop.permute.xlu0 %49 }
  0x75   :  { %204 = vst.msk [vmem:[%s436_s7 + $0x10] sm:$0xff] %vm201_vm3, %v195_v38  ;;  %v82_v42 = vmul.f32 %v222_v17, %v60_v40  ;;  %v80_v43 = vmul.f32 %v222_v17, %v50_v41 }
  0x76   :  { %v162_v46 = vpop.permute.xlu2 %161 }
  0x77   :  { %v88_v47 = vmul.f32 0.1, %v82_v42  ;;  %v86_v48 = vmul.f32 0.1, %v80_v43  ;;  %v182_v49 = vmul.f32 %v327_v32, %v162_v46 }
  0x78   :  { %v36_v44 = vld [vmem:[%s433_s0 + $0x10] sm:$0xff]  ;;  %v34_v45 = vld [vmem:[%s433_s0] sm:$0xff] }
  0x79   :  { %v94_v51 = vadd.f32 %v88_v47, %v36_v44  ;;  %v92_v52 = vadd.f32 %v86_v48, %v34_v45  ;;  %v190_v53 = vmul.f32 0.1, %v182_v49 }
  0x7b   :  { %v106_v54 = vsel %vm100_vm4, 0.0, %v94_v51  ;;  %v104_v55 = vsel %vm98_vm5, 0.0, %v92_v52 }
  0x7c   :  { %v122_v50 = vld [vmem:[%s435_s1 + $0x28] sm:$0xff]  ;;  %113 = vst.msk [vmem:[%s434_s6 + $0x10] sm:$0xff] %vm110_vm1, %v106_v54  ;;  %v65_v58 = vpop.permute.xlu1 %64  ;;  %v55_v60 = vpop.permute.xlu0 %54 }
  0x7d   :  { %v198_v56 = vadd.f32 %v190_v53, %v122_v50  ;;  %111 = vst.msk [vmem:[%s434_s6] sm:$0xff] %vm110_vm1, %v104_v55  ;;  %v83_v61 = vmul.f32 %v222_v17, %v65_v58  ;;  %v81_v62 = vmul.f32 %v222_v17, %v55_v60 }
  0x7f   :  { %207 = vst.msk [vmem:[%s436_s7 + $0x28] sm:$0xff] %vm201_vm3, %v198_v56  ;;  %v89_v1 = vmul.f32 0.1, %v83_v61  ;;  %v87_v2 = vmul.f32 0.1, %v81_v62 }
  0x84   :  { %v37_v63 = vld [vmem:[%s433_s0 + $0x18] sm:$0xff]  ;;  %v35_v0 = vld [vmem:[%s433_s0 + $0x8] sm:$0xff]  ;;  %v142_v7 = vpop.permute.xlu1 %141  ;;  %v137_v8 = vpop.permute.xlu0 %136 }
  0x85   :  { %v95_v3 = vadd.f32 %v89_v1, %v37_v63  ;;  %v93_v4 = vadd.f32 %v87_v2, %v35_v0  ;;  %v178_v9 = vmul.f32 %v327_v32, %v142_v7  ;;  %v177_v10 = vmul.f32 %v327_v32, %v137_v8 }
  0x86   :  { %v118_v11 = vld [vmem:[%s435_s1 + $0x8] sm:$0xff]  ;;  %v117_v12 = vld [vmem:[%s435_s1] sm:$0xff] }
  0x87   :  { %v107_v5 = vsel %vm101_vm6, 0.0, %v95_v3  ;;  %v105_v6 = vsel %vm99_vm7, 0.0, %v93_v4  ;;  %v186_v13 = vmul.f32 0.1, %v178_v9  ;;  %v185_v14 = vmul.f32 0.1, %v177_v10 }
  0x88   :  { %114 = vst.msk [vmem:[%s434_s6 + $0x18] sm:$0xff] %vm110_vm1, %v107_v5 }
  0x89   :  { %112 = vst.msk [vmem:[%s434_s6 + $0x8] sm:$0xff] %vm110_vm1, %v105_v6  ;;  %v194_v15 = vadd.f32 %v186_v13, %v118_v11  ;;  %v193_v16 = vadd.f32 %v185_v14, %v117_v12 }
  0x8b   :  { %203 = vst.msk [vmem:[%s436_s7 + $0x8] sm:$0xff] %vm201_vm3, %v194_v15 }
  0x8c   :  { %202 = vst.msk [vmem:[%s436_s7] sm:$0xff] %vm201_vm3, %v193_v16  ;;  %v157_v17 = vpop.permute.xlu1 %156  ;;  %v152_v18 = vpop.permute.xlu0 %151 }
  0x8d   :  { %v181_v19 = vmul.f32 %v327_v32, %v157_v17  ;;  %v180_v20 = vmul.f32 %v327_v32, %v152_v18 }
  0x8f   :  { %v189_v23 = vmul.f32 0.1, %v181_v19  ;;  %v188_v24 = vmul.f32 0.1, %v180_v20 }
  0x93   :  { %v121_v21 = vld [vmem:[%s435_s1 + $0x20] sm:$0xff]  ;;  %v120_v22 = vld [vmem:[%s435_s1 + $0x18] sm:$0xff] }
  0x94   :  { %v197_v25 = vadd.f32 %v189_v23, %v121_v21  ;;  %v196_v26 = vadd.f32 %v188_v24, %v120_v22  ;;  %v172_v27 = vpop.permute.xlu1 %171  ;;  %v167_v28 = vpop.permute.xlu0 %166 }
  0x95   :  { %v184_v29 = vmul.f32 %v327_v32, %v172_v27  ;;  %v183_v30 = vmul.f32 %v327_v32, %v167_v28 }
  0x96   :  { %206 = vst.msk [vmem:[%s436_s7 + $0x20] sm:$0xff] %vm201_vm3, %v197_v25 }
  0x97   :  { %205 = vst.msk [vmem:[%s436_s7 + $0x18] sm:$0xff] %vm201_vm3, %v196_v26  ;;  %v192_v34 = vmul.f32 0.1, %v184_v29  ;;  %v191_v35 = vmul.f32 0.1, %v183_v30 }
  0x9e   :  { %v124_v31 = vld [vmem:[%s435_s1 + $0x38] sm:$0xff]  ;;  %v123_v33 = vld [vmem:[%s435_s1 + $0x30] sm:$0xff] }
  0x9f   :  { %v200_v36 = vadd.f32 %v192_v34, %v124_v31  ;;  %v199_v37 = vadd.f32 %v191_v35, %v123_v33 }
  0xa1   :  { %209 = vst.msk [vmem:[%s436_s7 + $0x38] sm:$0xff] %vm201_vm3, %v200_v36 }
  0xa2   :  { %208 = vst.msk [vmem:[%s436_s7 + $0x30] sm:$0xff] %vm201_vm3, %v199_v37 }

</bundles_post_ra>
